<compile_context>
chip_gen: v7x
topology: tpu7x:2x2x1
jax: 0.10.0
libtpu: 0.0.40
codegen_flags: <defaults>
</compile_context>

<pallas_src>
import jax
import jax.numpy as jnp
from jax.experimental import pallas as pl
from jax.experimental.pallas import tpu as pltpu

# BipedalWalker-v3: observation dim 24, action dim 4 (hard-coded; no gym import).
STATE_SIZE = 24
ACTION_SIZE = 4
HIDDEN = 64

# Rows per grid step.  At TB=2048 the double-buffered input blocks use ~4-5 MiB
# of VMEM (24/4-lane rows are padded to 128 lanes), comfortably inside the
# default scoped VMEM limit on v5e/v6e/v7x.
MAX_TILE = 2048


def _round_up(x, m):
    return (x + m - 1) // m * m


def _choose_tile(B):
    """Pick the batch tile TB (multiple of 128) and the number of grid steps.

    Targets an even tile count (>= 2) whenever B is large enough so the
    'parallel' batch axis balances across both TensorCores on v7x."""
    B = max(int(B), 1)
    TB = min(MAX_TILE, _round_up(pl.cdiv(B, 2), 128))
    num_tiles = pl.cdiv(B, TB)
    if num_tiles > 1 and num_tiles % 2:
        TB = min(MAX_TILE, _round_up(pl.cdiv(B, num_tiles + 1), 128))
        num_tiles = pl.cdiv(B, TB)
    return TB, num_tiles


def _critic_kernel(s_ref, a_ref, w1s_ref, w1a_ref, b1_ref, w2_ref, b2_ref, o_ref):
    # s_ref: (TB, 24), a_ref: (TB, 4) -- fc1 with the concat folded in:
    #   h = state @ W1s + action @ W1a + b1   (MXU, f32 accumulate)
    h = (jnp.dot(s_ref[...], w1s_ref[...], preferred_element_type=jnp.float32)
         + jnp.dot(a_ref[...], w1a_ref[...], preferred_element_type=jnp.float32)
         + b1_ref[...])
    h = jnp.maximum(h, 0.0)  # single relu (second relu in the torch code is idempotent)

    # fc3 (64 -> 1) off the MXU: VPU broadcast-multiply + XLU lane reduce.
    # w2_ref: (1, 64) (same layout as torch fc3.weight), b2_ref: (1,) scalar in SMEM.
    q = jnp.sum(h * w2_ref[...], axis=-1) + b2_ref[0]    # (TB,)

    # Lane-dense (1, TB) store into the single-row output slab.
    o_ref[...] = q[None, :]


def critic_forward(state, action, params):
    """state: (B, STATE_SIZE) f32, action: (B, ACTION_SIZE) f32 -> (B, 1) f32."""
    w1s, w1a, b1, w2, b2 = params
    state = state.astype(jnp.float32)
    action = action.astype(jnp.float32)
    B = state.shape[0]

    TB, num_tiles = _choose_tile(B)

    out = pl.pallas_call(
        _critic_kernel,
        out_shape=jax.ShapeDtypeStruct((1, num_tiles * TB), jnp.float32),
        grid=(num_tiles,),
        in_specs=[
            # batch-tiled activations (ragged trailing block handled by Pallas;
            # the corresponding output columns are sliced off below)
            pl.BlockSpec((TB, STATE_SIZE), lambda i: (i, 0)),
            pl.BlockSpec((TB, ACTION_SIZE), lambda i: (i, 0)),
            # weights / biases: whole-array blocks, resident across the grid
            pl.BlockSpec((STATE_SIZE, HIDDEN), lambda i: (0, 0)),
            pl.BlockSpec((ACTION_SIZE, HIDDEN), lambda i: (0, 0)),
            pl.BlockSpec((1, HIDDEN), lambda i: (0, 0)),
            pl.BlockSpec((1, HIDDEN), lambda i: (0, 0)),
            # fc3 bias: scalar in SMEM
            pl.BlockSpec(memory_space=pltpu.MemorySpace.SMEM),
        ],
        out_specs=pl.BlockSpec((1, TB), lambda i: (0, i)),
        compiler_params=pltpu.CompilerParams(
            dimension_semantics=("parallel",)),  # megacore sharding on v7x
    )(state, action, w1s, w1a, b1, w2, b2)

    # Single lane-dense row, padded-batch order -> (B, 1).
    return out[0, :B, None]


def init_params(key):
    """nn.Linear default init U(-1/sqrt(fan_in), 1/sqrt(fan_in)).
    fc1 weight is stored transposed and split: w1_state (24,64), w1_action (4,64).
    fc3 weight is stored as a (1, 64) row (same as torch fc3.weight); bias is (1,)."""
    k1, k2, k3, k4, k5 = jax.random.split(key, 5)
    fan_in1 = STATE_SIZE + ACTION_SIZE
    bound1 = 1.0 / jnp.sqrt(jnp.float32(fan_in1))
    bound2 = 1.0 / jnp.sqrt(jnp.float32(HIDDEN))
    w1s = jax.random.uniform(k1, (STATE_SIZE, HIDDEN), jnp.float32, -bound1, bound1)
    w1a = jax.random.uniform(k2, (ACTION_SIZE, HIDDEN), jnp.float32, -bound1, bound1)
    b1 = jax.random.uniform(k3, (1, HIDDEN), jnp.float32, -bound1, bound1)
    w2 = jax.random.uniform(k4, (1, HIDDEN), jnp.float32, -bound2, bound2)
    b2 = jax.random.uniform(k5, (1,), jnp.float32, -bound2, bound2)
    return w1s, w1a, b1, w2, b2


def reference_forward(state, action, params):
    """Pure-JAX reference matching the torch forward."""
    w1s, w1a, b1, w2, b2 = params
    h = jnp.maximum(state @ w1s + action @ w1a + b1, 0.0)
    return jnp.sum(h * w2, axis=-1, keepdims=True) + b2


if __name__ == "__main__":
    key = jax.random.PRNGKey(0)
    kp, ks, ka = jax.random.split(key, 3)
    params = init_params(kp)

    # Small batch (single tile).
    B = 8
    state = jax.random.normal(ks, (B, STATE_SIZE), jnp.float32)
    action = jax.random.normal(ka, (B, ACTION_SIZE), jnp.float32)
    out = jax.block_until_ready(critic_forward(state, action, params))
    ref = reference_forward(state, action, params)
    assert out.shape == (B, 1), out.shape
    assert jnp.allclose(out, ref, atol=1e-4, rtol=1e-4), (out, ref)

    # Larger ragged batch: exercises the multi-tile grid + ragged-trailing-block
    # path (no host-side padding).
    B2 = 700
    s2 = jax.random.normal(jax.random.PRNGKey(1), (B2, STATE_SIZE), jnp.float32)
    a2 = jax.random.normal(jax.random.PRNGKey(2), (B2, ACTION_SIZE), jnp.float32)
    out2 = jax.block_until_ready(critic_forward(s2, a2, params))
    ref2 = reference_forward(s2, a2, params)
    assert out2.shape == (B2, 1), out2.shape
    assert jnp.allclose(out2, ref2, atol=1e-4, rtol=1e-4)

    print("KERNEL_OK")
</pallas_src>

<mosaic_0001>
module attributes {stable_mosaic.version = 11 : i64} {
  func.func @_critic_kernel(%arg0: i32, %arg1: memref<128x24xf32, #tpu.memory_space<vmem>>, %arg2: memref<128x4xf32, #tpu.memory_space<vmem>>, %arg3: memref<24x64xf32, #tpu.memory_space<vmem>>, %arg4: memref<4x64xf32, #tpu.memory_space<vmem>>, %arg5: memref<1x64xf32, #tpu.memory_space<vmem>>, %arg6: memref<1x64xf32, #tpu.memory_space<vmem>>, %arg7: memref<1xf32, #tpu.memory_space<smem>>, %arg8: memref<1x128xf32, #tpu.memory_space<vmem>>) attributes {dimension_semantics = [#tpu.dimension_semantics<parallel>], iteration_bounds = array<i64: 1>, scalar_prefetch = 0 : i64, scratch_operands = 0 : i64, tpu.core_type = #tpu.core_type<tc>, window_params = [{transform_indices = @transform_0, window_bounds = array<i64: 128, 24>}, {transform_indices = @transform_1, window_bounds = array<i64: 128, 4>}, {pipeline_mode = #tpu.pipeline_mode<synchronous>, transform_indices = @transform_2, window_bounds = array<i64: 24, 64>}, {pipeline_mode = #tpu.pipeline_mode<synchronous>, transform_indices = @transform_3, window_bounds = array<i64: 4, 64>}, {pipeline_mode = #tpu.pipeline_mode<synchronous>, transform_indices = @transform_4, window_bounds = array<i64: 1, 64>}, {pipeline_mode = #tpu.pipeline_mode<synchronous>, transform_indices = @transform_5, window_bounds = array<i64: 1, 64>}, {transform_indices = @transform_6, window_bounds = array<i64: 1>}, {transform_indices = @transform_7, window_bounds = array<i64: 1, 128>}]} {
    %c0 = arith.constant 0 : index
    %c0_0 = arith.constant 0 : index
    %0 = vector.load %arg1[%c0, %c0_0] : memref<128x24xf32, #tpu.memory_space<vmem>>, vector<128x24xf32>
    %c0_1 = arith.constant 0 : index
    %c0_2 = arith.constant 0 : index
    %1 = vector.load %arg3[%c0_1, %c0_2] : memref<24x64xf32, #tpu.memory_space<vmem>>, vector<24x64xf32>
    %cst = arith.constant dense<0.000000e+00> : vector<128x64xf32>
    %2 = tpu.matmul %0, %1, %cst {dimension_numbers = #tpu.dot_dimension_numbers<[1], [0], [0], [1], [0, 0, 1, 1], [], []>} : vector<128x24xf32>, vector<24x64xf32>, vector<128x64xf32> -> vector<128x64xf32>
    %c0_3 = arith.constant 0 : index
    %c0_4 = arith.constant 0 : index
    %3 = vector.load %arg2[%c0_3, %c0_4] : memref<128x4xf32, #tpu.memory_space<vmem>>, vector<128x4xf32>
    %c0_5 = arith.constant 0 : index
    %c0_6 = arith.constant 0 : index
    %4 = vector.load %arg4[%c0_5, %c0_6] : memref<4x64xf32, #tpu.memory_space<vmem>>, vector<4x64xf32>
    %cst_7 = arith.constant dense<0.000000e+00> : vector<128x64xf32>
    %5 = tpu.matmul %3, %4, %cst_7 {dimension_numbers = #tpu.dot_dimension_numbers<[1], [0], [0], [1], [0, 0, 1, 1], [], []>} : vector<128x4xf32>, vector<4x64xf32>, vector<128x64xf32> -> vector<128x64xf32>
    %6 = arith.addf %2, %5 : vector<128x64xf32>
    %c0_8 = arith.constant 0 : index
    %c0_9 = arith.constant 0 : index
    %7 = vector.load %arg5[%c0_8, %c0_9] : memref<1x64xf32, #tpu.memory_space<vmem>>, vector<1x64xf32>
    %8 = vector.broadcast %7 : vector<1x64xf32> to vector<128x64xf32>
    %9 = arith.addf %6, %8 : vector<128x64xf32>
    %cst_10 = arith.constant 0.000000e+00 : f32
    %10 = vector.broadcast %cst_10 : f32 to vector<128x64xf32>
    %11 = arith.maximumf %9, %10 : vector<128x64xf32>
    %c0_11 = arith.constant 0 : index
    %c0_12 = arith.constant 0 : index
    %12 = vector.load %arg6[%c0_11, %c0_12] : memref<1x64xf32, #tpu.memory_space<vmem>>, vector<1x64xf32>
    %13 = vector.broadcast %12 : vector<1x64xf32> to vector<128x64xf32>
    %14 = arith.mulf %11, %13 : vector<128x64xf32>
    %cst_13 = arith.constant dense<0.000000e+00> : vector<128xf32>
    %15 = vector.multi_reduction <add>, %14, %cst_13 [1] : vector<128x64xf32> to vector<128xf32>
    %c0_14 = arith.constant 0 : index
    %16 = memref.load %arg7[%c0_14] : memref<1xf32, #tpu.memory_space<smem>>
    %17 = vector.broadcast %16 : f32 to vector<128xf32>
    %18 = arith.addf %15, %17 : vector<128xf32>
    %19 = vector.shape_cast %18 : vector<128xf32> to vector<1x128xf32>
    %c0_15 = arith.constant 0 : index
    %c0_16 = arith.constant 0 : index
    %20 = vector.load %arg8[%c0_15, %c0_16] : memref<1x128xf32, #tpu.memory_space<vmem>>, vector<1x128xf32>
    tpu.vector_store %arg8[%c0_15, %c0_16], %19 {strides = array<i32>} : memref<1x128xf32, #tpu.memory_space<vmem>>, vector<1x128xf32>,
    return
  }
  func.func @transform_0(%arg0: i32) -> (i32, i32) {
    %c0_i32 = arith.constant 0 : i32
    %c0_i32_0 = arith.constant 0 : i32
    return %arg0, %c0_i32 : i32, i32
  }
  func.func @transform_1(%arg0: i32) -> (i32, i32) {
    %c0_i32 = arith.constant 0 : i32
    %c0_i32_0 = arith.constant 0 : i32
    return %arg0, %c0_i32 : i32, i32
  }
  func.func @transform_2(%arg0: i32) -> (i32, i32) {
    %c0_i32 = arith.constant 0 : i32
    %c0_i32_0 = arith.constant 0 : i32
    %c0_i32_1 = arith.constant 0 : i32
    return %c0_i32, %c0_i32_0 : i32, i32
  }
  func.func @transform_3(%arg0: i32) -> (i32, i32) {
    %c0_i32 = arith.constant 0 : i32
    %c0_i32_0 = arith.constant 0 : i32
    %c0_i32_1 = arith.constant 0 : i32
    return %c0_i32, %c0_i32_0 : i32, i32
  }
  func.func @transform_4(%arg0: i32) -> (i32, i32) {
    %c0_i32 = arith.constant 0 : i32
    %c0_i32_0 = arith.constant 0 : i32
    %c0_i32_1 = arith.constant 0 : i32
    return %c0_i32, %c0_i32_0 : i32, i32
  }
  func.func @transform_5(%arg0: i32) -> (i32, i32) {
    %c0_i32 = arith.constant 0 : i32
    %c0_i32_0 = arith.constant 0 : i32
    %c0_i32_1 = arith.constant 0 : i32
    return %c0_i32, %c0_i32_0 : i32, i32
  }
  func.func @transform_6(%arg0: i32) -> i32 {
    %c0_i32 = arith.constant 0 : i32
    %c0_i32_0 = arith.constant 0 : i32
    return %c0_i32 : i32
  }
  func.func @transform_7(%arg0: i32) -> (i32, i32) {
    %c0_i32 = arith.constant 0 : i32
    %c0_i32_0 = arith.constant 0 : i32
    return %c0_i32, %arg0 : i32, i32
  }
}

</mosaic_0001>

<bundles_post_ra>
// kernel: tpu_custom_call.1
= control target key start
LH: loop header
LB: loop body
LE: loop exit
PB: predicated region body
PF: predicated region fallthrough
CT: control target
= control target key end

     0   :  { %13 = vsyncpa [#allocation4], 0  ;;  %s1257_s0 = inlined_call_operand.vmem [shape: f32[8,24], index: 0, kind: input, shape index: {}]   ;;  %s1258_s1 = inlined_call_operand.vmem [shape: f32[8,4], index: 1, kind: input, shape index: {}]   ;;  %s1259_s2 = inlined_call_operand.hbm [shape: f32[24,64], index: 2, kind: input, shape index: {}]   ;;  %s1260_s3 = inlined_call_operand.vmem [shape: f32[4,64], index: 3, kind: input, shape index: {}]   ;;  %s1261_s4 = inlined_call_operand.vmem [shape: f32[1,64], index: 4, kind: input, shape index: {}]   ;;  %s1262_s5 = inlined_call_operand.vmem [shape: f32[1,64], index: 5, kind: input, shape index: {}]   ;;  %s1263_s6 = inlined_call_operand.<no memory space> [shape: f32[1], index: 6, kind: input, shape index: {}]   ;;  %s1264_s7 = inlined_call_operand.hbm [shape: f32[1,128], index: 7, kind: output, shape index: {}]  }
   0x1   :  { %14 = vsyncpa [#allocation5], 0  ;;  %s942_s24 = smov [#allocation3]   ;;  %s894_s28 = scalar_lea.hbm %s1259_s2, 384 }
   0x2   :  { %s24_s25 = sshll.u32 %s942_s24, 4  ;;  %p895_p0 = scmp.ne.s32.totalorder %s1259_s2, %s894_s28  ;;  %s25_s25 = int_to_ptr.vmem [resolvable:$true] %s24_s25 }
   0x3   :  { %p898_p1 = scmp.lt.u32.totalorder %s894_s28, %s1259_s2 }
   0x5   :  { %p900_p2 = pnand %p898_p1, %p895_p0 }
   0x7   :  { %903 = shalt.err (!%p900_p2)
}
   0x8   :  { %s904_s10 = scalar_lea.vmem %s25_s25, 384  ;;  %p909_p4 = scmp.lt.s32.totalorder %s25_s25, %s25_s25 }
   0x9   :  { %p905_p3 = scmp.ne.s32.totalorder %s25_s25, %s904_s10  ;;  %p910_p5 = scmp.lt.s32.totalorder %s904_s10, %s904_s10 }
   0xb   :  { %p911_p6 = por %p910_p5, %p909_p4 }
   0xd   :  { %p912_p7 = pnand %p911_p6, %p905_p3 }
   0xf   :  { %915 = shalt.err (!%p912_p7)
}
  0x10   :  { %s943_s11 = smov 128   ;;  %s944_s12 = smov 8  }
  0x11   :  { %30 = dma.hbm_to_vmem [thread:$0]  %s1259_s2, 384, %s25_s25, [#allocation4], %s943_s11, %s943_s11, %s944_s12  }
  0x12   :  { %938 = dma.done.wait [#allocation4], 384  }
  0x13   :  { %939 = vsyncadd [#allocation4], 4294966912  ;;  %vm127_vm0 = vcmask 1043456   ;;  %vm78_vm1 = vcmask 31744   ;;  %v58_v0 = vld [vmem:[#allocation3] sm:$0xff]  ;;  %v59_v1 = vld [vmem:[#allocation3 + $0x8] sm:$0xff] }
  0x14   :  { %v77_v2 = vld [vmem:[%s1260_s3] sm:$0xf]  ;;  %v870_v3 = vpack.c.bf16 %v59_v1, %v58_v0  ;;  %v62_v5 = vld [vmem:[%s1258_s1 + $0x8] sm:$0xff]  ;;  %vm276_vm2 = vcmask 195584   ;;  %v60_v6 = vld [vmem:[#allocation3 + $0x10] sm:$0xff]  ;;  %vm532_vm3 = vcmask 523264  }
  0x15   :  { %814 = vmatprep.subr.msk.mxu1 %vm127_vm0, %v77_v2  ;;  %v61_v4 = vld [vmem:[%s1258_s1] sm:$0xff]  ;;  %v63_v8 = vld [vmem:[%s1258_s1 + $0x10] sm:$0xff]  ;;  %v64_v9 = vld [vmem:[%s1258_s1 + $0x18] sm:$0xff]  ;;  %vm626_vm4 = vcmask 130112   ;;  %vm633_vm5 = vcmask 195712   ;;  %vm640_vm6 = vcmask 261312  }
  0x16   :  { %815 = vmatpush3.msk.msra.mxu1 %vm127_vm0, %v77_v2  ;;  %816 = vmatprep.mubr.msk.f32.mxu1 %vm78_vm1, %v61_v4  ;;  %v42_v7 = vld [vmem:[%s1257_s0] sm:$0xff]  ;;  %v43_v11 = vld [vmem:[%s1257_s0 + $0x8] sm:$0xff]  ;;  %v44_v12 = vld [vmem:[%s1257_s0 + $0x10] sm:$0xff]  ;;  %vm647_vm7 = vcmask 326912   ;;  %vm654_vm8 = vcmask 392512   ;;  %vm661_vm9 = vcmask 458112  }
  0x17   :  { %871 = vmatprep.subr.bf16.mxu0 %v870_v3  ;;  %817 = vmatmul.mubr.msk.f32.vlgmr.msra.gmra.mrb[0].mxu1 %vm78_vm1, %v62_v5  ;;  %v65_v10 = vld [vmem:[%s1258_s1 + $0x20] sm:$0xff]  ;;  %v66_v13 = vld [vmem:[%s1258_s1 + $0x28] sm:$0xff]  ;;  %v67_v14 = vld [vmem:[%s1258_s1 + $0x30] sm:$0xff]  ;;  %vm668_vm10 = vcmask 523712   ;;  %vm675_vm11 = vcmask 589312   ;;  %vm682_vm12 = vcmask 654912  }
  0x18   :  { %873 = vmatpush3.bf16.msra.mxu0 %v870_v3  ;;  %846 = vmatprep.mubr.msk.f32.mxu0 %vm276_vm2, %v42_v7  ;;  %v45_v15 = vld [vmem:[%s1257_s0 + $0x18] sm:$0xff]  ;;  %v46_v16 = vld [vmem:[%s1257_s0 + $0x20] sm:$0xff]  ;;  %v47_v19 = vld [vmem:[%s1257_s0 + $0x28] sm:$0xff]  ;;  %vm689_vm13 = vcmask 720512   ;;  %vm696_vm14 = vcmask 786112   ;;  %vm703_vm15 = vcmask 851712  }
  0x19   :  { %844 = vmatprep.subr.mxu0 %v60_v6  ;;  %819 = vmatprep.mubr.msk.f32.mxu1 %vm78_vm1, %v63_v8  ;;  %v68_v17 = vld [vmem:[%s1258_s1 + $0x38] sm:$0xff]  ;;  %v69_v18 = vld [vmem:[%s1258_s1 + $0x40] sm:$0xff]  ;;  %v48_v20 = vld [vmem:[%s1257_s0 + $0x30] sm:$0xff]  ;;  %vm710_vm0 = vcmask 917312  }
  0x1a   :  { %v70_v21 = vld [vmem:[%s1258_s1 + $0x48] sm:$0xff]  ;;  %v71_v22 = vld [vmem:[%s1258_s1 + $0x50] sm:$0xff]  ;;  %v49_v23 = vld [vmem:[%s1257_s0 + $0x38] sm:$0xff] }
  0x1b   :  { %820 = vmatmul.mubr.msk.f32.gmra.mrb[2].mxu1 %vm78_vm1, %v64_v9  ;;  %v50_v24 = vld [vmem:[%s1257_s0 + $0x40] sm:$0xff]  ;;  %v72_v25 = vld [vmem:[%s1258_s1 + $0x58] sm:$0xff]  ;;  %v51_v27 = vld [vmem:[%s1257_s0 + $0x48] sm:$0xff] }
  0x1c   :  { %845 = vmatpush3.msra.mxu0 %v60_v6  ;;  %822 = vmatprep.mubr.msk.f32.mxu1 %vm78_vm1, %v65_v10  ;;  %v73_v26 = vld [vmem:[%s1258_s1 + $0x60] sm:$0xff]  ;;  %v52_v28 = vld [vmem:[%s1257_s0 + $0x50] sm:$0xff]  ;;  %v74_v29 = vld [vmem:[%s1258_s1 + $0x68] sm:$0xff] }
  0x1d   :  { %847 = vmatmul.mubr.msk.f32.vlgmr.msra.gmra.mrb[0].mxu0 %vm276_vm2, %v43_v11  ;;  %v75_v30 = vld [vmem:[%s1258_s1 + $0x70] sm:$0xff]  ;;  %v53_v31 = vld [vmem:[%s1257_s0 + $0x58] sm:$0xff]  ;;  %v54_v32 = vld [vmem:[%s1257_s0 + $0x60] sm:$0xff] }
  0x1e   :  { %849 = vmatprep.mubr.msk.f32.mxu0 %vm276_vm2, %v44_v12  ;;  %v76_v33 = vld [vmem:[%s1258_s1 + $0x78] sm:$0xff]  ;;  %v55_v34 = vld [vmem:[%s1257_s0 + $0x68] sm:$0xff]  ;;  %v56_v35 = vld [vmem:[%s1257_s0 + $0x70] sm:$0xff] }
  0x1f   :  { %823 = vmatmul.mubr.msk.f32.gmra.mrb[4].mxu1 %vm78_vm1, %v66_v13  ;;  %v57_v36 = vld [vmem:[%s1257_s0 + $0x78] sm:$0xff]  ;;  %v1132_v42 = vld [vmem:[%s1261_s4] ss:$0 sm:$0xff] }
  0x20   :  { %825 = vmatprep.mubr.msk.f32.mxu1 %vm78_vm1, %v67_v14  ;;  %v1139_v51 = vld [vmem:[%s1262_s5] ss:$0 sm:$0xff] }
  0x21   :  { %850 = vmatmul.mubr.msk.f32.gmra.mrb[2].mxu0 %vm276_vm2, %v45_v15 }
  0x22   :  { %852 = vmatprep.mubr.msk.f32.mxu0 %vm276_vm2, %v46_v16 }
  0x23   :  { %826 = vmatmul.mubr.msk.f32.gmra.mrb[6].mxu1 %vm78_vm1, %v68_v17 }
  0x24   :  { %828 = vmatprep.mubr.msk.f32.mxu1 %vm78_vm1, %v69_v18 }
  0x25   :  { %853 = vmatmul.mubr.msk.f32.gmra.mrb[4].mxu0 %vm276_vm2, %v47_v19 }
  0x26   :  { %855 = vmatprep.mubr.msk.f32.mxu0 %vm276_vm2, %v48_v20 }
  0x27   :  { %829 = vmatmul.mubr.msk.f32.gmra.mrb[8].mxu1 %vm78_vm1, %v70_v21 }
  0x28   :  { %831 = vmatprep.mubr.msk.f32.mxu1 %vm78_vm1, %v71_v22 }
  0x29   :  { %856 = vmatmul.mubr.msk.f32.gmra.mrb[6].mxu0 %vm276_vm2, %v49_v23 }
  0x2a   :  { %858 = vmatprep.mubr.msk.f32.mxu0 %vm276_vm2, %v50_v24 }
  0x2b   :  { %832 = vmatmul.mubr.msk.f32.gmra.mrb[10].mxu1 %vm78_vm1, %v72_v25 }
  0x2c   :  { %834 = vmatprep.mubr.msk.f32.mxu1 %vm78_vm1, %v73_v26 }
  0x2d   :  { %859 = vmatmul.mubr.msk.f32.gmra.mrb[8].mxu0 %vm276_vm2, %v51_v27 }
  0x2e   :  { %861 = vmatprep.mubr.msk.f32.mxu0 %vm276_vm2, %v52_v28 }
  0x2f   :  { %835 = vmatmul.mubr.msk.f32.gmra.mrb[12].mxu1 %vm78_vm1, %v74_v29 }
  0x30   :  { %837 = vmatprep.mubr.msk.f32.mxu1 %vm78_vm1, %v75_v30 }
  0x31   :  { %862 = vmatmul.mubr.msk.f32.gmra.mrb[10].mxu0 %vm276_vm2, %v53_v31 }
  0x32   :  { %864 = vmatprep.mubr.msk.f32.mxu0 %vm276_vm2, %v54_v32 }
  0x33   :  { %838 = vmatmul.mubr.msk.f32.gmra.mrb[14].mxu1 %vm78_vm1, %v76_v33  ;;  %vm717_vm1 = vcmask 982912  }
  0x35   :  { %865 = vmatmul.mubr.msk.f32.gmra.mrb[12].mxu0 %vm276_vm2, %v55_v34 }
  0x36   :  { %867 = vmatprep.mubr.msk.f32.mxu0 %vm276_vm2, %v56_v35 }
  0x39   :  { %868 = vmatmul.mubr.msk.f32.gmra.mrb[14].mxu0 %vm276_vm2, %v57_v36  ;;  %vm724_vm2 = vcmask 1048512  }
  0xea   :  { %v818_v37 = vpop.f32.mrb[0].mxu1 }
  0xeb   :  { %v197_v38 = vpop.f32.mrb[1].mxu1 }
  0xee   :  { %v821_v39 = vpop.f32.mrb[2].mxu1 }
  0xef   :  { %v207_v40 = vpop.f32.mrb[3].mxu1 }
  0xf0   :  { %v848_v41 = vpop.f32.mrb[0].mxu0 }
  0xf1   :  { %v397_v43 = vadd.f32 %v848_v41, %v818_v37  ;;  %v391_v44 = vpop.f32.mrb[1].mxu0 }
  0xf2   :  { %v392_v45 = vadd.f32 %v391_v44, %v197_v38  ;;  %v824_v46 = vpop.f32.mrb[4].mxu1 }
  0xf3   :  { %v478_v47 = vadd.f32 %v1132_v42, %v397_v43  ;;  %v217_v48 = vpop.f32.mrb[5].mxu1 }
  0xf4   :  { %v477_v49 = vadd.f32 %v1132_v42, %v392_v45  ;;  %v851_v50 = vpop.f32.mrb[2].mxu0 }
  0xf5   :  { %v494_v52 = vmax.f32 %v478_v47, 0.0  ;;  %v407_v53 = vadd.f32 %v851_v50, %v821_v39  ;;  %v401_v54 = vpop.f32.mrb[3].mxu0 }
  0xf6   :  { %v493_v55 = vmax.f32 %v477_v49, 0.0  ;;  %v402_v56 = vadd.f32 %v401_v54, %v207_v40  ;;  %v827_v57 = vpop.f32.mrb[6].mxu1 }
  0xf7   :  { %v480_v58 = vadd.f32 %v1132_v42, %v407_v53  ;;  %v517_v59 = vmul.f32 %v1139_v51, %v494_v52  ;;  %v227_v60 = vpop.f32.mrb[7].mxu1 }
  0xf8   :  { %v479_v61 = vadd.f32 %v1132_v42, %v402_v56  ;;  %v854_v62 = vpop.f32.mrb[4].mxu0  ;;  %v516_v63 = vmul.f32 %v1139_v51, %v493_v55 }
  0xf9   :  { %v496_v0 = vmax.f32 %v480_v58, 0.0  ;;  %v417_v1 = vadd.f32 %v854_v62, %v824_v46  ;;  %v411_v2 = vpop.f32.mrb[5].mxu0  ;;  %v536_v3 = vsel %vm532_vm3, %v517_v59, 0.0 }
  0xfa   :  { %v495_v4 = vmax.f32 %v479_v61, 0.0  ;;  %v412_v5 = vadd.f32 %v411_v2, %v217_v48  ;;  %537 = vadd.xlane.f32.xlu0 %v536_v3  ;;  %v830_v6 = vpop.f32.mrb[8].mxu1  ;;  %v533_v12 = vsel %vm532_vm3, %v516_v63, 0.0 }
  0xfb   :  { %v482_v7 = vadd.f32 %v1132_v42, %v417_v1  ;;  %v519_v8 = vmul.f32 %v1139_v51, %v496_v0  ;;  %v237_v9 = vpop.f32.mrb[9].mxu1 }
  0xfc   :  { %v481_v10 = vadd.f32 %v1132_v42, %v412_v5  ;;  %v857_v11 = vpop.f32.mrb[6].mxu0  ;;  %v518_v17 = vmul.f32 %v1139_v51, %v495_v4 }
  0xfd   :  { %v498_v13 = vmax.f32 %v482_v7, 0.0  ;;  %v427_v14 = vadd.f32 %v857_v11, %v827_v57  ;;  %v421_v15 = vpop.f32.mrb[7].mxu0  ;;  %v542_v16 = vsel %vm532_vm3, %v519_v8, 0.0 }
  0xfe   :  { %v497_v18 = vmax.f32 %v481_v10, 0.0  ;;  %v422_v19 = vadd.f32 %v421_v15, %v227_v60  ;;  %543 = vadd.xlane.f32.xlu1 %v542_v16  ;;  %534 = vadd.xlane.f32.xlu0 %v533_v12  ;;  %v833_v20 = vpop.f32.mrb[10].mxu1  ;;  %v539_v29 = vsel %vm532_vm3, %v518_v17, 0.0 }
  0xff   :  { %v484_v21 = vadd.f32 %v1132_v42, %v427_v14  ;;  %v247_v22 = vpop.f32.mrb[11].mxu1  ;;  %v521_v30 = vmul.f32 %v1139_v51, %v498_v13 }
 0x100   :  { %v483_v23 = vadd.f32 %v1132_v42, %v422_v19  ;;  %v860_v24 = vpop.f32.mrb[8].mxu0  ;;  %v520_v25 = vmul.f32 %v1139_v51, %v497_v18 }
 0x101   :  { %v500_v26 = vmax.f32 %v484_v21, 0.0  ;;  %v437_v27 = vadd.f32 %v860_v24, %v830_v6  ;;  %v431_v28 = vpop.f32.mrb[9].mxu0  ;;  %v548_v44 = vsel %vm532_vm3, %v521_v30, 0.0  ;;  %v615_v24 = vlaneseq }
 0x102   :  { %v499_v31 = vmax.f32 %v483_v23, 0.0  ;;  %v432_v32 = vadd.f32 %v431_v28, %v237_v9  ;;  %540 = vadd.xlane.f32.xlu1 %v539_v29  ;;  %v545_v33 = vsel %vm532_vm3, %v520_v25, 0.0  ;;  %v836_v34 = vpop.f32.mrb[12].mxu1  ;;  %v1195_v29 = vstv %s1263_s6  ;;  %s945_s6 = smov [#allocation6]  }
 0x103   :  { %v486_v35 = vadd.f32 %v1132_v42, %v437_v27  ;;  %546 = vadd.xlane.f32.xlu0 %v545_v33  ;;  %v257_v36 = vpop.f32.mrb[13].mxu1  ;;  %v523_v45 = vmul.f32 %v1139_v51, %v500_v26  ;;  %v1187_v25 = vand.u32 127, %v615_v24  ;;  %v1189_v27 = vshrl.u32 %v615_v24, 7  ;;  %s734_s8 = sshll.u32 %s945_s6, 4  ;;  %s735_s8 = int_to_ptr.vmem [resolvable:$true] %s734_s8 }
 0x104   :  { %v485_v37 = vadd.f32 %v1132_v42, %v432_v32  ;;  %v863_v38 = vpop.f32.mrb[10].mxu0  ;;  %v522_v39 = vmul.f32 %v1139_v51, %v499_v31  ;;  %s916_s9 = scalar_lea.vmem %s735_s8, 16  ;;  %s920_s10 = scalar_lea.vmem %s735_s8, 32 }
 0x105   :  { %v502_v40 = vmax.f32 %v486_v35, 0.0  ;;  %v447_v41 = vadd.f32 %v863_v38, %v833_v20  ;;  %v441_v43 = vpop.f32.mrb[11].mxu0  ;;  %v554_v59 = vsel %vm532_vm3, %v523_v45, 0.0  ;;  %v621_v28 = vadd.s32 4294967288, %v1187_v25  ;;  %p917_p8 = scmp.ne.s32.totalorder %s735_s8, %s916_s9  ;;  %p921_p9 = scmp.lt.s32.totalorder %s735_s8, %s735_s8 }
 0x106   :  { %v501_v46 = vmax.f32 %v485_v37, 0.0  ;;  %v442_v47 = vadd.f32 %v441_v43, %v247_v22  ;;  %549 = vadd.xlane.f32.xlu1 %v548_v44  ;;  %v551_v48 = vsel %vm532_vm3, %v522_v39, 0.0  ;;  %v839_v49 = vpop.f32.mrb[14].mxu1  ;;  %v635_v30 = vadd.s32 4294967272, %v1187_v25  ;;  %p922_p10 = scmp.lt.s32.totalorder %s920_s10, %s916_s9 }
 0x107   :  { %v488_v50 = vadd.f32 %v1132_v42, %v447_v41  ;;  %552 = vadd.xlane.f32.xlu0 %v551_v48  ;;  %v267_v52 = vpop.f32.mrb[15].mxu1  ;;  %v525_v60 = vmul.f32 %v1139_v51, %v502_v40  ;;  %v619_v32 = vsub.s32 %v1187_v25, %v1189_v27  ;;  %v649_v38 = vadd.s32 4294967256, %v1187_v25 }
 0x108   :  { %v487_v53 = vadd.f32 %v1132_v42, %v442_v47  ;;  %v866_v54 = vpop.f32.mrb[12].mxu0  ;;  %v524_v55 = vmul.f32 %v1139_v51, %v501_v46  ;;  %v656_v40 = vadd.s32 4294967248, %v1187_v25  ;;  %v638_v41 = vsub.s32 %v635_v30, %v1189_v27  ;;  %p923_p11 = por %p922_p10, %p921_p9 }
 0x109   :  { %v504_v56 = vmax.f32 %v488_v50, 0.0  ;;  %v457_v57 = vadd.f32 %v866_v54, %v836_v34  ;;  %v451_v58 = vpop.f32.mrb[13].mxu0  ;;  %v560_v7 = vsel %vm532_vm3, %v525_v60, 0.0  ;;  %v642_v34 = vadd.s32 4294967264, %v1187_v25 }
 0x10a   :  { %v503_v61 = vmax.f32 %v487_v53, 0.0  ;;  %v452_v62 = vadd.f32 %v451_v58, %v257_v36  ;;  %555 = vadd.xlane.f32.xlu1 %v554_v59  ;;  %v557_v63 = vsel %vm532_vm3, %v524_v55, 0.0  ;;  %v624_v36 = vsub.s32 %v621_v28, %v1189_v27  ;;  %p924_p12 = pnand %p923_p11, %p917_p8 }
 0x10b   :  { %v490_v0 = vadd.f32 %v1132_v42, %v457_v57  ;;  %558 = vadd.xlane.f32.xlu0 %v557_v63  ;;  %v527_v8 = vmul.f32 %v1139_v51, %v504_v56  ;;  %v645_v46 = vsub.s32 %v642_v34, %v1189_v27  ;;  %v659_v54 = vsub.s32 %v656_v40, %v1189_v27 }
 0x10c   :  { %v489_v1 = vadd.f32 %v1132_v42, %v452_v62  ;;  %v869_v2 = vpop.f32.mrb[14].mxu0  ;;  %v526_v3 = vmul.f32 %v1139_v51, %v503_v61  ;;  %v663_v55 = vadd.s32 4294967240, %v1187_v25  ;;  %v670_v60 = vadd.s32 4294967232, %v1187_v25 }
 0x10d   :  { %v506_v4 = vmax.f32 %v490_v0, 0.0  ;;  %v467_v5 = vadd.f32 %v869_v2, %v839_v49  ;;  %v461_v6 = vpop.f32.mrb[15].mxu0  ;;  %v566_v16 = vsel %vm532_vm3, %v527_v8, 0.0  ;;  %v712_v34 = vadd.s32 4294967184, %v1187_v25 }
 0x10e   :  { %v505_v9 = vmax.f32 %v489_v1, 0.0  ;;  %v462_v10 = vadd.f32 %v461_v6, %v267_v52  ;;  %561 = vadd.xlane.f32.xlu1 %v560_v7  ;;  %v563_v11 = vsel %vm532_vm3, %v526_v3, 0.0  ;;  %v652_v52 = vsub.s32 %v649_v38, %v1189_v27 }
 0x10f   :  { %v492_v12 = vadd.f32 %v1132_v42, %v467_v5  ;;  %564 = vadd.xlane.f32.xlu0 %v563_v11  ;;  %v529_v17 = vmul.f32 %v1139_v51, %v506_v4  ;;  %v666_v4 = vsub.s32 %v663_v55, %v1189_v27  ;;  %v677_v5 = vadd.s32 4294967224, %v1187_v25 }
 0x110   :  { %v491_v13 = vadd.f32 %v1132_v42, %v462_v10  ;;  %v528_v14 = vmul.f32 %v1139_v51, %v505_v9  ;;  %v673_v8 = vsub.s32 %v670_v60, %v1189_v27  ;;  %v684_v9 = vadd.s32 4294967216, %v1187_v25 }
 0x111   :  { %v508_v15 = vmax.f32 %v492_v12, 0.0  ;;  %v572_v21 = vsel %vm532_vm3, %v529_v17, 0.0 }
 0x112   :  { %v507_v18 = vmax.f32 %v491_v13, 0.0  ;;  %567 = vadd.xlane.f32.xlu1 %v566_v16  ;;  %v569_v19 = vsel %vm532_vm3, %v528_v14, 0.0  ;;  %v691_v16 = vadd.s32 4294967208, %v1187_v25 }
 0x113   :  { %570 = vadd.xlane.f32.xlu0 %v569_v19  ;;  %v531_v22 = vmul.f32 %v1139_v51, %v508_v15  ;;  %v680_v15 = vsub.s32 %v677_v5, %v1189_v27 }
 0x114   :  { %v530_v20 = vmul.f32 %v1139_v51, %v507_v18  ;;  %v628_v51 = vadd.s32 4294967280, %v1187_v25  ;;  %v694_v28 = vsub.s32 %v691_v16, %v1189_v27 }
 0x115   :  { %v578_v23 = vsel %vm532_vm3, %v531_v22, 0.0 }
 0x116   :  { %573 = vadd.xlane.f32.xlu1 %v572_v21  ;;  %v575_v42 = vsel %vm532_vm3, %v530_v20, 0.0  ;;  %v631_v39 = vsub.s32 %v628_v51, %v1189_v27  ;;  %v687_v20 = vsub.s32 %v684_v9, %v1189_v27  ;;  %v698_v21 = vadd.s32 4294967200, %v1187_v25 }
 0x117   :  { %576 = vadd.xlane.f32.xlu0 %v575_v42  ;;  %v705_v51 = vadd.s32 4294967192, %v1187_v25 }
 0x119   :  { %v708_v40 = vsub.s32 %v705_v51, %v1189_v27 }
 0x11a   :  { %579 = vadd.xlane.f32.xlu1 %v578_v23 }
 0x187   :  { %v538_v26 = vpop.xlane.xlu0 %537 }
 0x188   :  { %v584_v37 = vadd.f32 %v1195_v29, %v538_v26 }
 0x18a   :  { %v625_v49 = vrot.slane %v584_v37, %v624_v36 }
 0x18b   :  { %v544_v31 = vpop.xlane.xlu1 %543  ;;  %v535_v33 = vpop.xlane.xlu0 %534 }
 0x18c   :  { %v583_v35 = vadd.f32 %v1195_v29, %v535_v33  ;;  %v586_v43 = vadd.f32 %v1195_v29, %v544_v31  ;;  %v701_v33 = vsub.s32 %v698_v21, %v1189_v27 }
 0x18e   :  { %v620_v44 = vrot.slane %v583_v35, %v619_v32  ;;  %v639_v56 = vrot.slane %v586_v43, %v638_v41  ;;  %v719_v41 = vadd.s32 4294967176, %v1187_v25 }
 0x18f   :  { %v541_v45 = vpop.xlane.xlu1 %540 }
 0x190   :  { %v585_v47 = vadd.f32 %v1195_v29, %v541_v45  ;;  %v547_v48 = vpop.xlane.xlu0 %546  ;;  %v627_v57 = vsel %vm626_vm4, %v625_v49, %v620_v44 }
 0x191   :  { %v587_v50 = vadd.f32 %v1195_v29, %v547_v48 }
 0x192   :  { %v632_v53 = vrot.slane %v585_v47, %v631_v39 }
 0x193   :  { %v646_v58 = vrot.slane %v587_v50, %v645_v46  ;;  %v550_v59 = vpop.xlane.xlu1 %549  ;;  %v715_v46 = vsub.s32 %v712_v34, %v1189_v27 }
 0x194   :  { %v634_v61 = vsel %vm633_vm5, %v632_v53, %v627_v57  ;;  %v588_v62 = vadd.f32 %v1195_v29, %v550_v59  ;;  %v553_v63 = vpop.xlane.xlu0 %552  ;;  %v722_v53 = vsub.s32 %v719_v41, %v1189_v27 }
 0x195   :  { %v641_v0 = vsel %vm640_vm6, %v639_v56, %v634_v61  ;;  %v589_v1 = vadd.f32 %v1195_v29, %v553_v63 }
 0x196   :  { %v648_v2 = vsel %vm647_vm7, %v646_v58, %v641_v0  ;;  %v653_v3 = vrot.slane %v588_v62, %v652_v52 }
 0x197   :  { %v660_v6 = vrot.slane %v589_v1, %v659_v54  ;;  %v556_v7 = vpop.xlane.xlu1 %555 }
 0x198   :  { %v655_v10 = vsel %vm654_vm8, %v653_v3, %v648_v2  ;;  %v590_v11 = vadd.f32 %v1195_v29, %v556_v7  ;;  %v559_v12 = vpop.xlane.xlu0 %558 }
 0x199   :  { %v591_v13 = vadd.f32 %v1195_v29, %v559_v12  ;;  %v662_v17 = vsel %vm661_vm9, %v660_v6, %v655_v10 }
 0x19a   :  { %v667_v14 = vrot.slane %v590_v11, %v666_v4 }
 0x19b   :  { %v674_v18 = vrot.slane %v591_v13, %v673_v8  ;;  %v562_v19 = vpop.xlane.xlu1 %561 }
 0x19c   :  { %v669_v22 = vsel %vm668_vm10, %v667_v14, %v662_v17  ;;  %v592_v42 = vadd.f32 %v1195_v29, %v562_v19  ;;  %v565_v23 = vpop.xlane.xlu0 %564 }
 0x19d   :  { %v593_v24 = vadd.f32 %v1195_v29, %v565_v23  ;;  %v676_v30 = vsel %vm675_vm11, %v674_v18, %v669_v22 }
 0x19e   :  { %v681_v26 = vrot.slane %v592_v42, %v680_v15 }
 0x19f   :  { %v688_v31 = vrot.slane %v593_v24, %v687_v20  ;;  %v568_v32 = vpop.xlane.xlu1 %567 }
 0x1a0   :  { %v683_v35 = vsel %vm682_vm12, %v681_v26, %v676_v30  ;;  %v594_v36 = vadd.f32 %v1195_v29, %v568_v32  ;;  %v571_v37 = vpop.xlane.xlu0 %570 }
 0x1a1   :  { %v595_v38 = vadd.f32 %v1195_v29, %v571_v37  ;;  %v690_v43 = vsel %vm689_vm13, %v688_v31, %v683_v35 }
 0x1a2   :  { %v695_v39 = vrot.slane %v594_v36, %v694_v28 }
 0x1a3   :  { %v702_v44 = vrot.slane %v595_v38, %v701_v33  ;;  %v574_v45 = vpop.xlane.xlu1 %573 }
 0x1a4   :  { %v697_v47 = vsel %vm696_vm14, %v695_v39, %v690_v43  ;;  %v596_v48 = vadd.f32 %v1195_v29, %v574_v45  ;;  %v577_v49 = vpop.xlane.xlu0 %576 }
 0x1a5   :  { %v597_v50 = vadd.f32 %v1195_v29, %v577_v49  ;;  %v704_v54 = vsel %vm703_vm15, %v702_v44, %v697_v47 }
 0x1a6   :  { %v709_v52 = vrot.slane %v596_v48, %v708_v40 }
 0x1a7   :  { %v716_v55 = vrot.slane %v597_v50, %v715_v46  ;;  %v580_v56 = vpop.xlane.xlu1 %579 }
 0x1a8   :  { %v711_v25 = vsel %vm710_vm0, %v709_v52, %v704_v54  ;;  %v598_v57 = vadd.f32 %v1195_v29, %v580_v56 }
 0x1a9   :  { %v718_v59 = vsel %vm717_vm1, %v716_v55, %v711_v25 }
 0x1aa   :  { %v723_v58 = vrot.slane %v598_v57, %v722_v53 }
 0x1ac   :  { %v725_v60 = vsel %vm724_vm2, %v723_v58, %v718_v59 }
 0x1ad   :  { %727 = vst [vmem:[#allocation6] sm:$0x1] %v725_v60 }
 0x1ae   :  { %927 = shalt.err (!%p924_p12)
}
 0x1af   :  { %s928_s13 = scalar_lea.hbm %s1264_s7, 16 }
 0x1b0   :  { %p929_p13 = scmp.ne.s32.totalorder %s1264_s7, %s928_s13  ;;  %p932_p0 = scmp.lt.u32.totalorder %s928_s13, %s1264_s7 }
 0x1b2   :  { %p934_p1 = pnand %p932_p0, %p929_p13 }
 0x1b4   :  { %937 = shalt.err (!%p934_p1)
}
 0x1b5   :  { %737 = dma.vmem_to_hbm [thread:$0]  %s735_s8, 16, %s1264_s7, [#allocation5]  }
 0x1b6   :  { %940 = dma.done.wait [#allocation5], 16  }
 0x1b7   :  { %941 = vsyncadd [#allocation5], 4294967280 }
 0x1b8   :  { %741 = vsyncpa [#allocation4], 1 }
 0x1b9   :  { %742 = vsyncpa [#allocation5], 1 }

</bundles_post_ra>
